<compile_context>
chip_gen: v7x
topology: tpu7x:2x2x1
jax: 0.10.0
libtpu: 0.0.40
codegen_flags: <defaults>
</compile_context>

<pallas_src>
import functools
import math

import jax
import jax.numpy as jnp
from jax.experimental import pallas as pl
from jax.experimental.pallas import tpu as pltpu


def _round_up(n, m):
    return ((n + m - 1) // m) * m


def _vmem_tile_bytes(shape, dtype):
    """Bytes a buffer occupies in VMEM (last dim padded to 128 lanes,
    second-to-last to 8 sublanes)."""
    shape = tuple(shape)
    if len(shape) == 1:
        shape = (1,) + shape
    rows = _round_up(shape[-2], 8)
    cols = _round_up(shape[-1], 128)
    lead = 1
    for d in shape[:-2]:
        lead *= int(d)
    return lead * rows * cols * jnp.dtype(dtype).itemsize


def _fused_mlp_kernel(x_ref, *args, n_layers, relu_last, compute_dtype,
                      precision):
    """Fused MLP over one row tile.

    x_ref : [ROW_TILE, Fin]           (input dtype)
    args  : (w0, b0, ..., w_{L-1}, b_{L-1}, o_ref)
            w_l : [Fin_l, Fout_l]     pre-transposed, compute_dtype
            b_l : [1, Fout_l]         fp32
    o_ref : [ROW_TILE, Fout]
    The activation stays resident in VMEM/vregs across all layers.
    Small/shallow nets use this fully unrolled loop.
    # TODO(synk): for very deep nets, stack identical hidden weights into one
    # [L-2, H, H] operand and iterate with lax.fori_loop to bound live ranges.
    """
    o_ref = args[-1]
    wb = args[:-1]
    h = x_ref[...]
    for layer in range(n_layers):  # fixed, small trip count -> unrolled
        w = wb[2 * layer][...]
        b = wb[2 * layer + 1][...]
        y = jnp.dot(h.astype(compute_dtype), w,
                    preferred_element_type=jnp.float32,
                    precision=precision)          # MXU, fp32 accumulate
        y = y + b                                 # fp32 bias add (VPU)
        if layer < n_layers - 1 or relu_last:
            y = jnp.maximum(y, 0.0)
        h = y
    o_ref[...] = h.astype(o_ref.dtype)


def init_fcblock_params(key, in_features, out_features, num_hidden_layers,
                        hidden_features):
    """Mimics init_weights_normal (kaiming normal, relu, fan_in) for weights
    and default nn.Linear uniform init for biases. W stored as [out, in]."""
    dims = ([in_features] + [hidden_features] * (num_hidden_layers + 1)
            + [out_features])
    params = []
    for i in range(len(dims) - 1):
        fan_in, fan_out = dims[i], dims[i + 1]
        key, kw, kb = jax.random.split(key, 3)
        std = math.sqrt(2.0) / math.sqrt(fan_in)
        w = std * jax.random.normal(kw, (fan_out, fan_in), dtype=jnp.float32)
        bound = 1.0 / math.sqrt(fan_in)
        b = jax.random.uniform(kb, (fan_out,), minval=-bound, maxval=bound,
                               dtype=jnp.float32)
        params.append((w, b))
    return params


def prepare_fcblock_params(params, compute_dtype=jnp.float32):
    """One-time relayout (hoisted out of the forward): W [out,in] -> W.T
    [in,out] in compute_dtype, bias -> [1,out] fp32. No padding: the kernel
    uses full-extent (unpadded) feature dims and lets Mosaic handle layout.
    NOTE: bf16 compute_dtype halves weight/activation DMA bytes (best on
    v5e/v6e/v7x MXUs) but relaxes the 1e-5 fp32 parity with PyTorch."""
    prepared = []
    for w, b in params:
        wt = jnp.asarray(w).T.astype(compute_dtype)
        bp = jnp.asarray(b).reshape(1, -1).astype(jnp.float32)
        prepared.append((wt, bp))
    return prepared


def fcblock_forward(coords, prepared_params, outermost_linear=False, *,
                    max_row_tile=1024, target_grid_steps=4):
    """coords: [..., in_features] -> [..., out_features] via one fused kernel.

    prepared_params: output of prepare_fcblock_params (done once, not per call).
    """
    orig_shape = coords.shape
    in_features = orig_shape[-1]
    out_features = prepared_params[-1][0].shape[1]
    out_dtype = coords.dtype
    n_layers = len(prepared_params)
    compute_dtype = prepared_params[0][0].dtype
    precision = (jax.lax.Precision.HIGHEST
                 if compute_dtype == jnp.float32
                 else jax.lax.Precision.DEFAULT)

    x = coords.reshape(-1, in_features)
    R = x.shape[0]

    # ---- row tiling: no HBM row-padding copy. The boundary tile (if any) is
    #      masked on store by Pallas; per-row independence keeps it correct.
    if R <= max_row_tile:
        row_tile = _round_up(R, 8)            # single tile, <=7 wasted rows
    else:
        # Aim for >= target_grid_steps steps (pipeline overlap + v7x 2-TC
        # sharding of the "parallel" axis) without dropping below 256 rows.
        row_tile = max(256, min(max_row_tile,
                                _round_up(pl.cdiv(R, target_grid_steps), 8)))
    grid = (pl.cdiv(R, row_tile),)

    kernel = functools.partial(
        _fused_mlp_kernel, n_layers=n_layers,
        relu_last=not outermost_linear, compute_dtype=compute_dtype,
        precision=precision)

    # Activation tile walks the row grid with its TRUE feature width (legal:
    # last block dim == full array dim). Weights/biases use constant block
    # indices -> DMA'd once, resident in VMEM across all grid steps.
    in_specs = [pl.BlockSpec((row_tile, in_features), lambda i: (i, 0))]
    flat_wb = []
    for wt, bp in prepared_params:
        in_specs.append(pl.BlockSpec(wt.shape, lambda i: (0, 0)))
        in_specs.append(pl.BlockSpec(bp.shape, lambda i: (0, 0)))
        flat_wb.extend([wt, bp])

    # ---- cost estimate on the real (unpadded) sizes.
    cd_size = jnp.dtype(compute_dtype).itemsize
    flops = 2 * R * sum(wt.shape[0] * wt.shape[1] for wt, _ in prepared_params)
    bytes_accessed = (
        R * in_features * jnp.dtype(coords.dtype).itemsize
        + R * out_features * jnp.dtype(out_dtype).itemsize
        + sum(wt.size * cd_size + bp.size * 4 for wt, bp in prepared_params))
    cost = pl.CostEstimate(flops=int(flops), transcendentals=0,
                           bytes_accessed=int(bytes_accessed))

    # ---- explicit VMEM budget (double-buffered I/O tiles + resident weights
    #      + per-layer fp32 intermediates), capped at v7x's 64 MiB physical.
    layer_widths = [in_features] + [wt.shape[1] for wt, _ in prepared_params]
    vmem_est = (
        2 * _vmem_tile_bytes((row_tile, in_features), compute_dtype)
        + 2 * _vmem_tile_bytes((row_tile, out_features), out_dtype)
        + 2 * sum(_vmem_tile_bytes(wt.shape, compute_dtype)
                  + _vmem_tile_bytes(bp.shape, jnp.float32)
                  for wt, bp in prepared_params)
        + sum(_vmem_tile_bytes((row_tile, w), jnp.float32)
              for w in layer_widths))
    vmem_limit = int(min(max(int(vmem_est * 1.5), 32 << 20), 64 << 20))

    out = pl.pallas_call(
        kernel,
        out_shape=jax.ShapeDtypeStruct((R, out_features), out_dtype),
        grid=grid,
        in_specs=in_specs,
        out_specs=pl.BlockSpec((row_tile, out_features), lambda i: (i, 0)),
        compiler_params=pltpu.CompilerParams(
            dimension_semantics=("parallel",),
            vmem_limit_bytes=vmem_limit),
        cost_estimate=cost,
    )(x, *flat_wb)

    return out.reshape(orig_shape[:-1] + (out_features,))


def _reference(coords, params, outermost_linear):
    x = coords.reshape(-1, coords.shape[-1]).astype(jnp.float32)
    n = len(params)
    for i, (w, b) in enumerate(params):
        x = jnp.dot(x, w.T, precision=jax.lax.Precision.HIGHEST) + b
        if i < n - 1 or not outermost_linear:
            x = jnp.maximum(x, 0.0)
    return x.reshape(coords.shape[:-1] + (params[-1][0].shape[0],))


if __name__ == "__main__":
    key = jax.random.PRNGKey(0)
    key, kx1, kx2, kx3 = jax.random.split(key, 4)

    # Module-consistent small shapes: in=4, hidden=32, out=2, 2 hidden layers.
    in_features, out_features = 4, 2
    num_hidden_layers, hidden_features = 2, 32
    raw_params = init_fcblock_params(key, in_features, out_features,
                                     num_hidden_layers, hidden_features)
    params = prepare_fcblock_params(raw_params)   # hoisted, done once

    # Case 1: batch=2, seq=8, outermost_linear=False (ReLU after last layer).
    coords = jax.random.normal(kx1, (2, 8, in_features), dtype=jnp.float32)
    out = jax.block_until_ready(
        fcblock_forward(coords, params, outermost_linear=False))
    ref = _reference(coords, raw_params, outermost_linear=False)
    assert out.shape == (2, 8, out_features)
    assert jnp.allclose(out, ref, atol=1e-5, rtol=1e-5)

    # Case 2: non-multiple-of-tile row count, outermost_linear=True
    #         (no ReLU on the last layer).
    coords2 = jax.random.normal(kx2, (1, 520, in_features), dtype=jnp.float32)
    out2 = jax.block_until_ready(
        fcblock_forward(coords2, params, outermost_linear=True))
    ref2 = _reference(coords2, raw_params, outermost_linear=True)
    assert out2.shape == (1, 520, out_features)
    assert jnp.allclose(out2, ref2, atol=1e-5, rtol=1e-5)

    # Case 3: exercises the multi-step row grid + masked boundary tile
    #         (R=2500 -> row_tile=632, 4 grid steps, last tile partially OOB).
    coords3 = jax.random.normal(kx3, (2, 1250, in_features), dtype=jnp.float32)
    out3 = jax.block_until_ready(
        fcblock_forward(coords3, params, outermost_linear=False))
    ref3 = _reference(coords3, raw_params, outermost_linear=False)
    assert out3.shape == (2, 1250, out_features)
    assert jnp.allclose(out3, ref3, atol=1e-5, rtol=1e-5)

    print("KERNEL_OK")
</pallas_src>

<mosaic_0001>
module attributes {stable_mosaic.version = 11 : i64} {
  func.func @_fused_mlp_kernel(%arg0: i32, %arg1: memref<16x4xf32, #tpu.memory_space<vmem>>, %arg2: memref<4x32xf32, #tpu.memory_space<vmem>>, %arg3: memref<1x32xf32, #tpu.memory_space<vmem>>, %arg4: memref<32x32xf32, #tpu.memory_space<vmem>>, %arg5: memref<1x32xf32, #tpu.memory_space<vmem>>, %arg6: memref<32x32xf32, #tpu.memory_space<vmem>>, %arg7: memref<1x32xf32, #tpu.memory_space<vmem>>, %arg8: memref<32x2xf32, #tpu.memory_space<vmem>>, %arg9: memref<1x2xf32, #tpu.memory_space<vmem>>, %arg10: memref<16x2xf32, #tpu.memory_space<vmem>>) attributes {dimension_semantics = [#tpu.dimension_semantics<parallel>], iteration_bounds = array<i64: 1>, scalar_prefetch = 0 : i64, scratch_operands = 0 : i64, tpu.core_type = #tpu.core_type<tc>, window_params = [{transform_indices = @transform_0, window_bounds = array<i64: 16, 4>}, {pipeline_mode = #tpu.pipeline_mode<synchronous>, transform_indices = @transform_1, window_bounds = array<i64: 4, 32>}, {pipeline_mode = #tpu.pipeline_mode<synchronous>, transform_indices = @transform_2, window_bounds = array<i64: 1, 32>}, {pipeline_mode = #tpu.pipeline_mode<synchronous>, transform_indices = @transform_3, window_bounds = array<i64: 32, 32>}, {pipeline_mode = #tpu.pipeline_mode<synchronous>, transform_indices = @transform_4, window_bounds = array<i64: 1, 32>}, {pipeline_mode = #tpu.pipeline_mode<synchronous>, transform_indices = @transform_5, window_bounds = array<i64: 32, 32>}, {pipeline_mode = #tpu.pipeline_mode<synchronous>, transform_indices = @transform_6, window_bounds = array<i64: 1, 32>}, {pipeline_mode = #tpu.pipeline_mode<synchronous>, transform_indices = @transform_7, window_bounds = array<i64: 32, 2>}, {pipeline_mode = #tpu.pipeline_mode<synchronous>, transform_indices = @transform_8, window_bounds = array<i64: 1, 2>}, {transform_indices = @transform_9, window_bounds = array<i64: 16, 2>}]} {
    %c0 = arith.constant 0 : index
    %c0_0 = arith.constant 0 : index
    %0 = vector.load %arg1[%c0, %c0_0] : memref<16x4xf32, #tpu.memory_space<vmem>>, vector<16x4xf32>
    %c0_1 = arith.constant 0 : index
    %c0_2 = arith.constant 0 : index
    %1 = vector.load %arg2[%c0_1, %c0_2] : memref<4x32xf32, #tpu.memory_space<vmem>>, vector<4x32xf32>
    %c0_3 = arith.constant 0 : index
    %c0_4 = arith.constant 0 : index
    %2 = vector.load %arg3[%c0_3, %c0_4] : memref<1x32xf32, #tpu.memory_space<vmem>>, vector<1x32xf32>
    %cst = arith.constant dense<0.000000e+00> : vector<16x32xf32>
    %3 = tpu.matmul %0, %1, %cst {dimension_numbers = #tpu.dot_dimension_numbers<[1], [0], [0], [1], [0, 0, 1, 1], [], []>, precision = #tpu.contract_precision<fp32>} : vector<16x4xf32>, vector<4x32xf32>, vector<16x32xf32> -> vector<16x32xf32>
    %4 = vector.broadcast %2 : vector<1x32xf32> to vector<16x32xf32>
    %5 = arith.addf %3, %4 : vector<16x32xf32>
    %cst_5 = arith.constant 0.000000e+00 : f32
    %6 = vector.broadcast %cst_5 : f32 to vector<16x32xf32>
    %7 = arith.maximumf %5, %6 : vector<16x32xf32>
    %c0_6 = arith.constant 0 : index
    %c0_7 = arith.constant 0 : index
    %8 = vector.load %arg4[%c0_6, %c0_7] : memref<32x32xf32, #tpu.memory_space<vmem>>, vector<32x32xf32>
    %c0_8 = arith.constant 0 : index
    %c0_9 = arith.constant 0 : index
    %9 = vector.load %arg5[%c0_8, %c0_9] : memref<1x32xf32, #tpu.memory_space<vmem>>, vector<1x32xf32>
    %cst_10 = arith.constant dense<0.000000e+00> : vector<16x32xf32>
    %10 = tpu.matmul %7, %8, %cst_10 {dimension_numbers = #tpu.dot_dimension_numbers<[1], [0], [0], [1], [0, 0, 1, 1], [], []>, precision = #tpu.contract_precision<fp32>} : vector<16x32xf32>, vector<32x32xf32>, vector<16x32xf32> -> vector<16x32xf32>
    %11 = vector.broadcast %9 : vector<1x32xf32> to vector<16x32xf32>
    %12 = arith.addf %10, %11 : vector<16x32xf32>
    %cst_11 = arith.constant 0.000000e+00 : f32
    %13 = vector.broadcast %cst_11 : f32 to vector<16x32xf32>
    %14 = arith.maximumf %12, %13 : vector<16x32xf32>
    %c0_12 = arith.constant 0 : index
    %c0_13 = arith.constant 0 : index
    %15 = vector.load %arg6[%c0_12, %c0_13] : memref<32x32xf32, #tpu.memory_space<vmem>>, vector<32x32xf32>
    %c0_14 = arith.constant 0 : index
    %c0_15 = arith.constant 0 : index
    %16 = vector.load %arg7[%c0_14, %c0_15] : memref<1x32xf32, #tpu.memory_space<vmem>>, vector<1x32xf32>
    %cst_16 = arith.constant dense<0.000000e+00> : vector<16x32xf32>
    %17 = tpu.matmul %14, %15, %cst_16 {dimension_numbers = #tpu.dot_dimension_numbers<[1], [0], [0], [1], [0, 0, 1, 1], [], []>, precision = #tpu.contract_precision<fp32>} : vector<16x32xf32>, vector<32x32xf32>, vector<16x32xf32> -> vector<16x32xf32>
    %18 = vector.broadcast %16 : vector<1x32xf32> to vector<16x32xf32>
    %19 = arith.addf %17, %18 : vector<16x32xf32>
    %cst_17 = arith.constant 0.000000e+00 : f32
    %20 = vector.broadcast %cst_17 : f32 to vector<16x32xf32>
    %21 = arith.maximumf %19, %20 : vector<16x32xf32>
    %c0_18 = arith.constant 0 : index
    %c0_19 = arith.constant 0 : index
    %22 = vector.load %arg8[%c0_18, %c0_19] : memref<32x2xf32, #tpu.memory_space<vmem>>, vector<32x2xf32>
    %c0_20 = arith.constant 0 : index
    %c0_21 = arith.constant 0 : index
    %23 = vector.load %arg9[%c0_20, %c0_21] : memref<1x2xf32, #tpu.memory_space<vmem>>, vector<1x2xf32>
    %cst_22 = arith.constant dense<0.000000e+00> : vector<16x2xf32>
    %24 = tpu.matmul %21, %22, %cst_22 {dimension_numbers = #tpu.dot_dimension_numbers<[1], [0], [0], [1], [0, 0, 1, 1], [], []>, precision = #tpu.contract_precision<fp32>} : vector<16x32xf32>, vector<32x2xf32>, vector<16x2xf32> -> vector<16x2xf32>
    %25 = vector.broadcast %23 : vector<1x2xf32> to vector<16x2xf32>
    %26 = arith.addf %24, %25 : vector<16x2xf32>
    %cst_23 = arith.constant 0.000000e+00 : f32
    %27 = vector.broadcast %cst_23 : f32 to vector<16x2xf32>
    %28 = arith.maximumf %26, %27 : vector<16x2xf32>
    %c0_24 = arith.constant 0 : index
    %c0_25 = arith.constant 0 : index
    %29 = vector.load %arg10[%c0_24, %c0_25] : memref<16x2xf32, #tpu.memory_space<vmem>>, vector<16x2xf32>
    tpu.vector_store %arg10[%c0_24, %c0_25], %28 {strides = array<i32>} : memref<16x2xf32, #tpu.memory_space<vmem>>, vector<16x2xf32>,
    return
  }
  func.func @transform_0(%arg0: i32) -> (i32, i32) {
    %c0_i32 = arith.constant 0 : i32
    %c0_i32_0 = arith.constant 0 : i32
    return %arg0, %c0_i32 : i32, i32
  }
  func.func @transform_1(%arg0: i32) -> (i32, i32) {
    %c0_i32 = arith.constant 0 : i32
    %c0_i32_0 = arith.constant 0 : i32
    %c0_i32_1 = arith.constant 0 : i32
    return %c0_i32, %c0_i32_0 : i32, i32
  }
  func.func @transform_2(%arg0: i32) -> (i32, i32) {
    %c0_i32 = arith.constant 0 : i32
    %c0_i32_0 = arith.constant 0 : i32
    %c0_i32_1 = arith.constant 0 : i32
    return %c0_i32, %c0_i32_0 : i32, i32
  }
  func.func @transform_3(%arg0: i32) -> (i32, i32) {
    %c0_i32 = arith.constant 0 : i32
    %c0_i32_0 = arith.constant 0 : i32
    %c0_i32_1 = arith.constant 0 : i32
    return %c0_i32, %c0_i32_0 : i32, i32
  }
  func.func @transform_4(%arg0: i32) -> (i32, i32) {
    %c0_i32 = arith.constant 0 : i32
    %c0_i32_0 = arith.constant 0 : i32
    %c0_i32_1 = arith.constant 0 : i32
    return %c0_i32, %c0_i32_0 : i32, i32
  }
  func.func @transform_5(%arg0: i32) -> (i32, i32) {
    %c0_i32 = arith.constant 0 : i32
    %c0_i32_0 = arith.constant 0 : i32
    %c0_i32_1 = arith.constant 0 : i32
    return %c0_i32, %c0_i32_0 : i32, i32
  }
  func.func @transform_6(%arg0: i32) -> (i32, i32) {
    %c0_i32 = arith.constant 0 : i32
    %c0_i32_0 = arith.constant 0 : i32
    %c0_i32_1 = arith.constant 0 : i32
    return %c0_i32, %c0_i32_0 : i32, i32
  }
  func.func @transform_7(%arg0: i32) -> (i32, i32) {
    %c0_i32 = arith.constant 0 : i32
    %c0_i32_0 = arith.constant 0 : i32
    %c0_i32_1 = arith.constant 0 : i32
    return %c0_i32, %c0_i32_0 : i32, i32
  }
  func.func @transform_8(%arg0: i32) -> (i32, i32) {
    %c0_i32 = arith.constant 0 : i32
    %c0_i32_0 = arith.constant 0 : i32
    %c0_i32_1 = arith.constant 0 : i32
    return %c0_i32, %c0_i32_0 : i32, i32
  }
  func.func @transform_9(%arg0: i32) -> (i32, i32) {
    %c0_i32 = arith.constant 0 : i32
    %c0_i32_0 = arith.constant 0 : i32
    return %arg0, %c0_i32 : i32, i32
  }
}

</mosaic_0001>

<bundles_post_ra>
// kernel: tpu_custom_call.1
= control target key start
LH: loop header
LB: loop body
LE: loop exit
PB: predicated region body
PF: predicated region fallthrough
CT: control target
= control target key end

     0   :  { %14 = vsyncpa [#allocation3], 0  ;;  %s2781_s30 = smov [#allocation2]   ;;  %s2958_s0 = inlined_call_operand.vmem [shape: f32[16,4], index: 0, kind: input, shape index: {}]   ;;  %s2959_s1 = inlined_call_operand.hbm [shape: f32[4,32], index: 1, kind: input, shape index: {}]   ;;  %s2960_s2 = inlined_call_operand.vmem [shape: f32[1,32], index: 2, kind: input, shape index: {}]   ;;  %s2961_s3 = inlined_call_operand.vmem [shape: f32[32,32], index: 3, kind: input, shape index: {}]   ;;  %s2962_s4 = inlined_call_operand.vmem [shape: f32[1,32], index: 4, kind: input, shape index: {}]   ;;  %s2963_s5 = inlined_call_operand.vmem [shape: f32[32,32], index: 5, kind: input, shape index: {}]   ;;  %s2964_s6 = inlined_call_operand.vmem [shape: f32[1,32], index: 6, kind: input, shape index: {}]   ;;  %s2965_s7 = inlined_call_operand.vmem [shape: f32[32,2], index: 7, kind: input, shape index: {}]   ;;  %s2966_s8 = inlined_call_operand.vmem [shape: f32[1,2], index: 8, kind: input, shape index: {}]   ;;  %s2967_s9 = inlined_call_operand.vmem [shape: f32[16,2], index: 9, kind: output, shape index: {}]  }
   0x1   :  { %s23_s10 = sshll.u32 %s2781_s30, 4  ;;  %s2757_s13 = scalar_lea.hbm %s2959_s1, 64  ;;  %s24_s10 = int_to_ptr.vmem [resolvable:$true] %s23_s10 }
   0x2   :  { %p2758_p0 = scmp.ne.s32.totalorder %s2959_s1, %s2757_s13  ;;  %p2761_p1 = scmp.lt.u32.totalorder %s2757_s13, %s2959_s1 }
   0x4   :  { %p2763_p2 = pnand %p2761_p1, %p2758_p0 }
   0x6   :  { %2766 = shalt.err (!%p2763_p2)
}
   0x7   :  { %s2767_s18 = scalar_lea.vmem %s24_s10, 64  ;;  %p2772_p4 = scmp.lt.s32.totalorder %s24_s10, %s24_s10 }
   0x8   :  { %p2768_p3 = scmp.ne.s32.totalorder %s24_s10, %s2767_s18  ;;  %p2773_p5 = scmp.lt.s32.totalorder %s2767_s18, %s2767_s18 }
   0xa   :  { %p2774_p6 = por %p2773_p5, %p2772_p4 }
   0xc   :  { %p2775_p7 = pnand %p2774_p6, %p2768_p3 }
   0xe   :  { %2778 = shalt.err (!%p2775_p7)
}
   0xf   :  { %26 = dma.hbm_to_vmem [thread:$0]  %s2959_s1, 64, %s24_s10, [#allocation3]  }
  0x10   :  { %2779 = dma.done.wait [#allocation3], 64  }
  0x11   :  { %2780 = vsyncadd [#allocation3], 4294967232  ;;  %vm61_vm0 = vcmask 1043456   ;;  %vm54_vm1 = vcmask 31744   ;;  %v46_v0 = vld [vmem:[#allocation2] sm:$0xf] }
  0x12   :  { %v44_v1 = vld [vmem:[%s2958_s0] sm:$0xff]  ;;  %v45_v2 = vld [vmem:[%s2958_s0 + $0x8] sm:$0xff]  ;;  %v63_v3 = vsel %vm61_vm0, %v46_v0, 0  ;;  %v558_v27 = vld [vmem:[%s2961_s3 + $0x10] sm:$0xff]  ;;  %vm567_vm2 = vcmask 261120   ;;  %vm2198_vm3 = vcmask 15360  }
  0x13   :  { %v56_v4 = vsel %vm54_vm1, %v44_v1, 0  ;;  %v59_v5 = vsel %vm54_vm1, %v45_v2, 0  ;;  %v66_v6 = vand.u32 4294901760, %v63_v3  ;;  %v556_v21 = vld [vmem:[%s2961_s3] sm:$0xff]  ;;  %v557_v22 = vld [vmem:[%s2961_s3 + $0x8] sm:$0xff]  ;;  %v559_v28 = vld [vmem:[%s2961_s3 + $0x18] sm:$0xff] }
  0x14   :  { %v131_v7 = vand.u32 4294901760, %v56_v4  ;;  %v141_v8 = vand.u32 4294901760, %v59_v5  ;;  %v575_v23 = vand.u32 4294901760, %v556_v21  ;;  %v578_v24 = vand.u32 4294901760, %v557_v22  ;;  %v2206_v55 = vld [vmem:[%s2960_s2] ss:$0 sm:$0xff] }
  0x15   :  { %v153_v9 = vsub.f32 %v63_v3, %v66_v6  ;;  %2336 = vmatprep.subr.mxu1 %v66_v6  ;;  %v581_v30 = vand.u32 4294901760, %v558_v27  ;;  %v584_v31 = vand.u32 4294901760, %v559_v28 }
  0x16   :  { %2343 = vmatprep.mubr.f32.mxu0 %v131_v7  ;;  %v132_v10 = vsub.f32 %v56_v4, %v131_v7  ;;  %v142_v11 = vsub.f32 %v59_v5, %v141_v8  ;;  %2337 = vmatpush3.msra.mxu1 %v66_v6  ;;  %v665_v25 = vsub.f32 %v556_v21, %v575_v23 }
  0x17   :  { %v154_v12 = vand.u32 4294901760, %v153_v9  ;;  %v672_v26 = vsub.f32 %v557_v22, %v578_v24  ;;  %v679_v32 = vsub.f32 %v558_v27, %v581_v30  ;;  %v686_v33 = vsub.f32 %v559_v28, %v584_v31 }
  0x18   :  { %v133_v13 = vand.u32 4294901760, %v132_v10  ;;  %v143_v14 = vand.u32 4294901760, %v142_v11  ;;  %v2862_v35 = vpack.c.bf16 %v578_v24, %v575_v23  ;;  %v2864_v36 = vpack.c.bf16 %v584_v31, %v581_v30 }
  0x19   :  { %v155_v15 = vsub.f32 %v153_v9, %v154_v12  ;;  %v2580_v29 = vpack.c.bf16 %v672_v26, %v665_v25  ;;  %v2584_v34 = vpack.c.bf16 %v686_v33, %v679_v32  ;;  %v666_v37 = vand.u32 4294901760, %v665_v25 }
  0x1a   :  { %v134_v16 = vsub.f32 %v132_v10, %v133_v13  ;;  %v144_v17 = vsub.f32 %v142_v11, %v143_v14  ;;  %v673_v38 = vand.u32 4294901760, %v672_v26  ;;  %v680_v43 = vand.u32 4294901760, %v679_v32 }
  0x1b   :  { %v156_v18 = vand.u32 4294901760, %v155_v15  ;;  %2581 = vmatprep.subr.bf16.mxu1 %v2580_v29  ;;  %v667_v39 = vsub.f32 %v665_v25, %v666_v37  ;;  %v687_v44 = vand.u32 4294901760, %v686_v33 }
  0x1c   :  { %v135_v19 = vand.u32 4294901760, %v134_v16  ;;  %v145_v20 = vand.u32 4294901760, %v144_v17  ;;  %v674_v40 = vsub.f32 %v672_v26, %v673_v38  ;;  %v681_v46 = vsub.f32 %v679_v32, %v680_v43 }
  0x1d   :  { %2341 = vmatprep.subr.mxu0 %v156_v18  ;;  %v668_v41 = vand.u32 4294901760, %v667_v39  ;;  %v688_v47 = vsub.f32 %v686_v33, %v687_v44  ;;  %v2596_v48 = vpack.c.bf16 %v673_v38, %v666_v37  ;;  %v2600_v52 = vpack.c.bf16 %v687_v44, %v680_v43 }
  0x1e   :  { %2338 = vmatprep.mubr.f32.mxu1 %v135_v19  ;;  %2342 = vmatpush3.msra.mxu0 %v156_v18  ;;  %v675_v42 = vand.u32 4294901760, %v674_v40  ;;  %v682_v49 = vand.u32 4294901760, %v681_v46  ;;  %v1106_v19 = vld [vmem:[%s2963_s5 + $0x10] sm:$0xff]  ;;  %v2207_v46 = vld [vmem:[%s2962_s4] ss:$0 sm:$0xff] }
  0x1f   :  { %2339 = vmatmul.mubr.f32.vlgmr.msra.gmra.mrb[0].mxu1 %v145_v20  ;;  %2344 = vmatmul.mubr.f32.vlgmr.msra.gmra.mrb[0].mxu0 %v141_v8  ;;  %v689_v50 = vand.u32 4294901760, %v688_v47  ;;  %v1107_v20 = vld [vmem:[%s2963_s5 + $0x18] sm:$0xff]  ;;  %v1128_v21 = vand.u32 4294901760, %v1106_v19 }
  0x20   :  { %2346 = vmatprep.subr.mxu0 %v153_v9  ;;  %2348 = vmatprep.mubr.f32.mxu0 %v132_v10  ;;  %v2572_v45 = vpack.c.bf16 %v675_v42, %v668_v41  ;;  %v1131_v22 = vand.u32 4294901760, %v1107_v20 }
  0x21   :  { %2347 = vmatpush3.msra.mxu0 %v153_v9  ;;  %2583 = vmatpush3.bf16.msra.mxu1 %v2580_v29  ;;  %v2576_v51 = vpack.c.bf16 %v689_v50, %v682_v49  ;;  %v1226_v28 = vsub.f32 %v1106_v19, %v1128_v21 }
  0x22   :  { %2351 = vmatprep.subr.mxu0 %v66_v6  ;;  %2585 = vmatprep.subr.bf16.mxu1 %v2584_v34  ;;  %v2899_v25 = vpack.c.bf16 %v1131_v22, %v1128_v21  ;;  %v1233_v29 = vsub.f32 %v1107_v20, %v1131_v22 }
  0x23   :  { %v1227_v32 = vand.u32 4294901760, %v1226_v28 }
  0x24   :  { %v1234_v33 = vand.u32 4294901760, %v1233_v29  ;;  %v2632_v41 = vpack.c.bf16 %v1233_v29, %v1226_v28 }
  0x25   :  { %2587 = vmatpush3.bf16.msra.mxu1 %v2584_v34 }
  0x26   :  { %2589 = vmatprep.subr.bf16.mxu1 %v2862_v35  ;;  %v2648_v43 = vpack.c.bf16 %v1234_v33, %v1227_v32 }
  0x27   :  { %2349 = vmatmul.mubr.f32.vlgmr.msra.gmra.mrb[0].mxu0 %v142_v11 }
  0x28   :  { %2352 = vmatpush3.msra.mxu0 %v66_v6  ;;  %2353 = vmatprep.mubr.f32.mxu0 %v133_v13  ;;  %v1105_v13 = vld [vmem:[%s2963_s5 + $0x8] sm:$0xff] }
  0x29   :  { %2356 = vmatprep.subr.mxu0 %v154_v12  ;;  %v1125_v15 = vand.u32 4294901760, %v1105_v13 }
  0x2b   :  { %v1219_v18 = vsub.f32 %v1105_v13, %v1125_v15 }
  0x2d   :  { %v1220_v24 = vand.u32 4294901760, %v1219_v18 }
  0x2f   :  { %2354 = vmatmul.mubr.f32.vlgmr.msra.gmra.mrb[0].mxu0 %v143_v14  ;;  %v1221_v27 = vsub.f32 %v1219_v18, %v1220_v24 }
  0x30   :  { %2357 = vmatpush3.msra.mxu0 %v154_v12  ;;  %2358 = vmatprep.mubr.f32.mxu0 %v131_v7  ;;  %v1104_v12 = vld [vmem:[%s2963_s5] sm:$0xff] }
  0x31   :  { %2361 = vmatprep.subr.mxu0 %v66_v6  ;;  %v1122_v14 = vand.u32 4294901760, %v1104_v12  ;;  %v1222_v31 = vand.u32 4294901760, %v1221_v27 }
  0x33   :  { %v2889_v16 = vpack.c.bf16 %v1125_v15, %v1122_v14  ;;  %v1212_v17 = vsub.f32 %v1104_v12, %v1122_v14 }
  0x35   :  { %v1213_v23 = vand.u32 4294901760, %v1212_v17  ;;  %v2628_v40 = vpack.c.bf16 %v1219_v18, %v1212_v17 }
  0x37   :  { %2359 = vmatmul.mubr.f32.vlgmr.msra.gmra.mrb[0].mxu0 %v141_v8  ;;  %v1214_v26 = vsub.f32 %v1212_v17, %v1213_v23  ;;  %v2644_v42 = vpack.c.bf16 %v1220_v24, %v1213_v23 }
  0x38   :  { %2362 = vmatpush3.msra.mxu0 %v66_v6  ;;  %2363 = vmatprep.mubr.f32.mxu0 %v131_v7 }
  0x39   :  { %2565 = vmatprep.subr.bf16.mxu0 %v2862_v35  ;;  %v1215_v30 = vand.u32 4294901760, %v1214_v26 }
  0x3b   :  { %v2620_v34 = vpack.c.bf16 %v1222_v31, %v1215_v30 }
  0x3f   :  { %2364 = vmatmul.mubr.f32.vlgmr.msra.gmra.mrb[0].mxu0 %v141_v8 }
  0x40   :  { %2567 = vmatpush3.bf16.msra.mxu0 %v2862_v35 }
  0x41   :  { %2569 = vmatprep.subr.bf16.mxu0 %v2864_v36 }
  0x44   :  { %2571 = vmatpush3.bf16.msra.mxu0 %v2864_v36 }
  0x45   :  { %2573 = vmatprep.subr.bf16.mxu0 %v2572_v45 }
  0xf2   :  { %v2340_v53 = vpop.f32.mrb[0].mxu1 }
  0xf3   :  { %v137_v54 = vpop.f32.mrb[1].mxu1  ;;  %v148_v56 = vadd.f32 %v2340_v53, %v2206_v55 }
  0xf4   :  { %v138_v57 = vadd.f32 %v2206_v55, %v137_v54 }
 0x112   :  { %v2365_v58 = vpop.f32.mrb[0].mxu0 }
 0x113   :  { %v2709_v59 = vadd.f32 %v2365_v58, %v148_v56  ;;  %v544_v60 = vpop.f32.mrb[1].mxu0 }
 0x114   :  { %v2711_v61 = vadd.f32 %v544_v60, %v138_v57 }
 0x115   :  { %v555_v62 = vmax.f32 %v2709_v59, 0.0 }
 0x116   :  { %v554_v63 = vmax.f32 %v2711_v61, 0.0 }
 0x117   :  { %v572_v0 = vsel %vm567_vm2, %v555_v62, 0 }
 0x118   :  { %v653_v1 = vand.u32 4294901760, %v572_v0  ;;  %v569_v2 = vsel %vm567_vm2, %v554_v63, 0 }
 0x119   :  { %v643_v3 = vand.u32 4294901760, %v569_v2 }
 0x11a   :  { %v654_v4 = vsub.f32 %v572_v0, %v653_v1 }
 0x11b   :  { %v644_v5 = vsub.f32 %v569_v2, %v643_v3 }
 0x11c   :  { %v655_v6 = vand.u32 4294901760, %v654_v4 }
 0x11d   :  { %2396 = vmatprep.mubr.f32.mxu1 %v644_v5  ;;  %v645_v7 = vand.u32 4294901760, %v644_v5 }
 0x11e   :  { %2397 = vmatmul.mubr.f32.vlgmr.msra.gmra.mrb[2].mxu1 %v654_v4  ;;  %v656_v8 = vsub.f32 %v654_v4, %v655_v6  ;;  %v1652_v4 = vld [vmem:[%s2965_s7 + $0x8] sm:$0xff] }
 0x11f   :  { %2591 = vmatpush3.bf16.msra.mxu1 %v2862_v35  ;;  %2407 = vmatprep.mubr.f32.mxu1 %v645_v7  ;;  %v646_v9 = vsub.f32 %v644_v5, %v645_v7 }
 0x120   :  { %2593 = vmatprep.subr.bf16.mxu1 %v2864_v36  ;;  %v657_v11 = vand.u32 4294901760, %v656_v8 }
 0x121   :  { %v647_v10 = vand.u32 4294901760, %v646_v9 }
 0x123   :  { %2374 = vmatprep.mubr.f32.mxu0 %v647_v10  ;;  %2595 = vmatpush3.bf16.msra.mxu1 %v2864_v36  ;;  %v1653_v10 = vld [vmem:[%s2965_s7 + $0x10] sm:$0xff] }
 0x124   :  { %2375 = vmatmul.mubr.f32.vlgmr.msra.gmra.mrb[2].mxu0 %v657_v11  ;;  %2597 = vmatprep.subr.bf16.mxu1 %v2596_v48  ;;  %v1654_v11 = vld [vmem:[%s2965_s7 + $0x18] sm:$0xff]  ;;  %v1675_v12 = vand.u32 4294901760, %v1653_v10 }
 0x125   :  { %2575 = vmatpush3.bf16.msra.mxu0 %v2572_v45  ;;  %2385 = vmatprep.mubr.f32.mxu0 %v643_v3  ;;  %v1678_v13 = vand.u32 4294901760, %v1654_v11 }
 0x126   :  { %2408 = vmatmul.mubr.f32.vlgmr.msra.gmra.mrb[2].mxu1 %v655_v6  ;;  %2577 = vmatprep.subr.bf16.mxu0 %v2576_v51  ;;  %v1672_v6 = vand.u32 4294901760, %v1652_v4  ;;  %v1773_v19 = vsub.f32 %v1653_v10, %v1675_v12 }
 0x127   :  { %2599 = vmatpush3.bf16.msra.mxu1 %v2596_v48  ;;  %2418 = vmatprep.mubr.f32.mxu1 %v643_v3  ;;  %v1780_v20 = vsub.f32 %v1654_v11, %v1678_v13 }
 0x128   :  { %2601 = vmatprep.subr.bf16.mxu1 %v2600_v52  ;;  %v1766_v9 = vsub.f32 %v1652_v4, %v1672_v6  ;;  %v1774_v23 = vand.u32 4294901760, %v1773_v19 }
 0x129   :  { %2579 = vmatpush3.bf16.msra.mxu0 %v2576_v51  ;;  %v1781_v24 = vand.u32 4294901760, %v1780_v20 }
 0x12a   :  { %2613 = vmatprep.subr.bf16.mxu0 %v2889_v16  ;;  %v1767_v15 = vand.u32 4294901760, %v1766_v9  ;;  %v1775_v26 = vsub.f32 %v1773_v19, %v1774_v23 }
 0x12b   :  { %2603 = vmatpush3.bf16.msra.mxu1 %v2600_v52  ;;  %v1782_v27 = vsub.f32 %v1780_v20, %v1781_v24 }
 0x12c   :  { %2386 = vmatmul.mubr.f32.vlgmr.msra.gmra.mrb[2].mxu0 %v653_v1  ;;  %2605 = vmatprep.subr.bf16.mxu1 %v2862_v35  ;;  %v1768_v18 = vsub.f32 %v1766_v9, %v1767_v15 }
 0x12d   :  { %2615 = vmatpush3.bf16.msra.mxu0 %v2889_v16 }
 0x12e   :  { %2419 = vmatmul.mubr.f32.vlgmr.msra.gmra.mrb[2].mxu1 %v653_v1  ;;  %2617 = vmatprep.subr.bf16.mxu0 %v2899_v25  ;;  %v1769_v22 = vand.u32 4294901760, %v1768_v18 }
 0x12f   :  { %2607 = vmatpush3.bf16.msra.mxu1 %v2862_v35  ;;  %2429 = vmatprep.mubr.f32.mxu1 %v643_v3  ;;  %v1228_v35 = vsub.f32 %v1226_v28, %v1227_v32  ;;  %v1651_v3 = vld [vmem:[%s2965_s7] sm:$0xff]  ;;  %v1776_v28 = vand.u32 4294901760, %v1775_v26  ;;  %v2680_v32 = vpack.c.bf16 %v1780_v20, %v1773_v19 }
 0x130   :  { %2609 = vmatprep.subr.bf16.mxu1 %v2864_v36  ;;  %v1669_v5 = vand.u32 4294901760, %v1651_v3 }
 0x131   :  { %2619 = vmatpush3.bf16.msra.mxu0 %v2899_v25  ;;  %v1229_v37 = vand.u32 4294901760, %v1228_v35  ;;  %v2208_v35 = vld [vmem:[%s2964_s6] ss:$0 sm:$0xff] }
 0x132   :  { %2621 = vmatprep.subr.bf16.mxu0 %v2620_v34  ;;  %v2922_v7 = vpack.c.bf16 %v1672_v6, %v1669_v5  ;;  %v1759_v8 = vsub.f32 %v1651_v3, %v1669_v5 }
 0x133   :  { %2611 = vmatpush3.bf16.msra.mxu1 %v2864_v36  ;;  %v1235_v36 = vsub.f32 %v1233_v29, %v1234_v33  ;;  %v1783_v29 = vand.u32 4294901760, %v1782_v27 }
 0x134   :  { %2661 = vmatprep.subr.bf16.mxu1 %v2922_v7  ;;  %v1760_v14 = vand.u32 4294901760, %v1759_v8  ;;  %v2676_v31 = vpack.c.bf16 %v1766_v9, %v1759_v8 }
 0x135   :  { %v1236_v38 = vand.u32 4294901760, %v1235_v36  ;;  %v2672_v30 = vpack.c.bf16 %v1783_v29, %v1776_v28 }
 0x136   :  { %2430 = vmatmul.mubr.f32.vlgmr.msra.gmra.mrb[2].mxu1 %v653_v1  ;;  %v1761_v17 = vsub.f32 %v1759_v8, %v1760_v14  ;;  %v2692_v33 = vpack.c.bf16 %v1767_v15, %v1760_v14 }
 0x137   :  { %v2624_v39 = vpack.c.bf16 %v1236_v38, %v1229_v37  ;;  %2663 = vmatpush3.bf16.msra.mxu1 %v2922_v7 }
 0x138   :  { %v1762_v21 = vand.u32 4294901760, %v1761_v17 }
 0x1ff   :  { %v2387_v44 = vpop.f32.mrb[2].mxu0 }
 0x200   :  { %v750_v45 = vpop.f32.mrb[3].mxu0  ;;  %v2712_v47 = vadd.f32 %v2387_v44, %v2207_v46 }
 0x201   :  { %v2714_v48 = vadd.f32 %v2207_v46, %v750_v45 }
 0x209   :  { %v2431_v49 = vpop.f32.mrb[2].mxu1 }
 0x20a   :  { %v2713_v50 = vadd.f32 %v2712_v47, %v2431_v49  ;;  %v1092_v51 = vpop.f32.mrb[3].mxu1 }
 0x20b   :  { %v2715_v52 = vadd.f32 %v2714_v48, %v1092_v51 }
 0x20c   :  { %v1103_v53 = vmax.f32 %v2713_v50, 0.0 }
 0x20d   :  { %v1102_v54 = vmax.f32 %v2715_v52, 0.0 }
 0x20e   :  { %v1119_v55 = vsel %vm567_vm2, %v1103_v53, 0 }
 0x20f   :  { %v1200_v56 = vand.u32 4294901760, %v1119_v55  ;;  %v1116_v57 = vsel %vm567_vm2, %v1102_v54, 0  ;;  %v2209_v54 = vld [vmem:[%s2966_s8] ss:$0 sm:$0xff] }
 0x210   :  { %v1190_v58 = vand.u32 4294901760, %v1116_v57 }
 0x211   :  { %v1201_v59 = vsub.f32 %v1119_v55, %v1200_v56 }
 0x212   :  { %v1191_v60 = vsub.f32 %v1116_v57, %v1190_v58 }
 0x213   :  { %v1202_v61 = vand.u32 4294901760, %v1201_v59 }
 0x214   :  { %v1192_v62 = vand.u32 4294901760, %v1191_v60 }
 0x215   :  { %v1203_v63 = vsub.f32 %v1201_v59, %v1202_v61 }
 0x216   :  { %v1193_v0 = vsub.f32 %v1191_v60, %v1192_v62 }
 0x217   :  { %v1204_v2 = vand.u32 4294901760, %v1203_v63 }
 0x218   :  { %v1194_v1 = vand.u32 4294901760, %v1193_v0 }
 0x21a   :  { %2440 = vmatprep.mubr.f32.mxu0 %v1194_v1 }
 0x21b   :  { %2441 = vmatmul.mubr.f32.vlgmr.msra.gmra.mrb[4].mxu0 %v1204_v2 }
 0x21c   :  { %2623 = vmatpush3.bf16.msra.mxu0 %v2620_v34  ;;  %2451 = vmatprep.mubr.f32.mxu0 %v1190_v58  ;;  %v2696_v34 = vpack.c.bf16 %v1781_v24, %v1774_v23 }
 0x21d   :  { %2625 = vmatprep.subr.bf16.mxu0 %v2624_v39 }
 0x220   :  { %2627 = vmatpush3.bf16.msra.mxu0 %v2624_v39 }
 0x221   :  { %2629 = vmatprep.subr.bf16.mxu0 %v2628_v40 }
 0x223   :  { %2452 = vmatmul.mubr.f32.vlgmr.msra.gmra.mrb[4].mxu0 %v1200_v56 }
 0x224   :  { %2631 = vmatpush3.bf16.msra.mxu0 %v2628_v40  ;;  %2462 = vmatprep.mubr.f32.mxu0 %v1191_v60 }
 0x225   :  { %2633 = vmatprep.subr.bf16.mxu0 %v2632_v41 }
 0x228   :  { %2635 = vmatpush3.bf16.msra.mxu0 %v2632_v41 }
 0x229   :  { %2637 = vmatprep.subr.bf16.mxu0 %v2889_v16 }
 0x22b   :  { %2463 = vmatmul.mubr.f32.vlgmr.msra.gmra.mrb[4].mxu0 %v1201_v59 }
 0x22c   :  { %2639 = vmatpush3.bf16.msra.mxu0 %v2889_v16  ;;  %2473 = vmatprep.mubr.f32.mxu0 %v1192_v62 }
 0x22d   :  { %2641 = vmatprep.subr.bf16.mxu0 %v2899_v25 }
 0x230   :  { %2643 = vmatpush3.bf16.msra.mxu0 %v2899_v25 }
 0x231   :  { %2645 = vmatprep.subr.bf16.mxu0 %v2644_v42 }
 0x233   :  { %2474 = vmatmul.mubr.f32.vlgmr.msra.gmra.mrb[4].mxu0 %v1202_v61 }
 0x234   :  { %2647 = vmatpush3.bf16.msra.mxu0 %v2644_v42  ;;  %2484 = vmatprep.mubr.f32.mxu0 %v1190_v58 }
 0x235   :  { %2649 = vmatprep.subr.bf16.mxu0 %v2648_v43 }
 0x238   :  { %2651 = vmatpush3.bf16.msra.mxu0 %v2648_v43 }
 0x239   :  { %2653 = vmatprep.subr.bf16.mxu0 %v2889_v16 }
 0x23b   :  { %2485 = vmatmul.mubr.f32.vlgmr.msra.gmra.mrb[4].mxu0 %v1200_v56 }
 0x23c   :  { %2655 = vmatpush3.bf16.msra.mxu0 %v2889_v16  ;;  %2495 = vmatprep.mubr.f32.mxu0 %v1190_v58  ;;  %v2932_v16 = vpack.c.bf16 %v1678_v13, %v1675_v12 }
 0x23d   :  { %2657 = vmatprep.subr.bf16.mxu0 %v2899_v25 }
 0x23e   :  { %2665 = vmatprep.subr.bf16.mxu1 %v2932_v16 }
 0x23f   :  { %2667 = vmatpush3.bf16.msra.mxu1 %v2932_v16 }
 0x240   :  { %2659 = vmatpush3.bf16.msra.mxu0 %v2899_v25  ;;  %v2668_v25 = vpack.c.bf16 %v1769_v22, %v1762_v21 }
 0x242   :  { %2669 = vmatprep.subr.bf16.mxu1 %v2668_v25 }
 0x243   :  { %2496 = vmatmul.mubr.f32.vlgmr.msra.gmra.mrb[4].mxu0 %v1200_v56 }
 0x316   :  { %v2497_v36 = vpop.f32.mrb[4].mxu0 }
 0x317   :  { %v2716_v37 = vadd.f32 %v2497_v36, %v2208_v35  ;;  %v1639_v38 = vpop.f32.mrb[5].mxu0 }
 0x318   :  { %v2717_v39 = vadd.f32 %v2208_v35, %v1639_v38 }
 0x319   :  { %v1650_v40 = vmax.f32 %v2716_v37, 0.0 }
 0x31a   :  { %v1649_v41 = vmax.f32 %v2717_v39, 0.0 }
 0x31b   :  { %v1666_v42 = vsel %vm567_vm2, %v1650_v40, 0 }
 0x31c   :  { %v1747_v43 = vand.u32 4294901760, %v1666_v42  ;;  %v1663_v44 = vsel %vm567_vm2, %v1649_v41, 0 }
 0x31d   :  { %v1737_v45 = vand.u32 4294901760, %v1663_v44 }
 0x31e   :  { %v1748_v46 = vsub.f32 %v1666_v42, %v1747_v43 }
 0x31f   :  { %v1738_v47 = vsub.f32 %v1663_v44, %v1737_v45 }
 0x320   :  { %v1749_v48 = vand.u32 4294901760, %v1748_v46 }
 0x321   :  { %v1739_v49 = vand.u32 4294901760, %v1738_v47 }
 0x322   :  { %v1750_v50 = vsub.f32 %v1748_v46, %v1749_v48 }
 0x323   :  { %v1740_v51 = vsub.f32 %v1738_v47, %v1739_v49 }
 0x324   :  { %v1751_v53 = vand.u32 4294901760, %v1750_v50 }
 0x325   :  { %v1741_v52 = vand.u32 4294901760, %v1740_v51 }
 0x327   :  { %2506 = vmatprep.mubr.f32.mxu1 %v1741_v52 }
 0x328   :  { %2507 = vmatmul.mubr.f32.vlgmr.msra.gmra.mrb[4].mxu1 %v1751_v53 }
 0x329   :  { %2671 = vmatpush3.bf16.msra.mxu1 %v2668_v25  ;;  %2517 = vmatprep.mubr.f32.mxu1 %v1737_v45 }
 0x32a   :  { %2673 = vmatprep.subr.bf16.mxu1 %v2672_v30 }
 0x32d   :  { %2675 = vmatpush3.bf16.msra.mxu1 %v2672_v30 }
 0x32e   :  { %2677 = vmatprep.subr.bf16.mxu1 %v2676_v31 }
 0x330   :  { %2518 = vmatmul.mubr.f32.vlgmr.msra.gmra.mrb[4].mxu1 %v1747_v43 }
 0x331   :  { %2679 = vmatpush3.bf16.msra.mxu1 %v2676_v31  ;;  %2528 = vmatprep.mubr.f32.mxu1 %v1738_v47 }
 0x332   :  { %2681 = vmatprep.subr.bf16.mxu1 %v2680_v32 }
 0x335   :  { %2683 = vmatpush3.bf16.msra.mxu1 %v2680_v32 }
 0x336   :  { %2685 = vmatprep.subr.bf16.mxu1 %v2922_v7 }
 0x338   :  { %2529 = vmatmul.mubr.f32.vlgmr.msra.gmra.mrb[4].mxu1 %v1748_v46 }
 0x339   :  { %2687 = vmatpush3.bf16.msra.mxu1 %v2922_v7  ;;  %2539 = vmatprep.mubr.f32.mxu1 %v1739_v49 }
 0x33a   :  { %2689 = vmatprep.subr.bf16.mxu1 %v2932_v16 }
 0x33d   :  { %2691 = vmatpush3.bf16.msra.mxu1 %v2932_v16 }
 0x33e   :  { %2693 = vmatprep.subr.bf16.mxu1 %v2692_v33 }
 0x340   :  { %2540 = vmatmul.mubr.f32.vlgmr.msra.gmra.mrb[4].mxu1 %v1749_v48 }
 0x341   :  { %2695 = vmatpush3.bf16.msra.mxu1 %v2692_v33  ;;  %2550 = vmatprep.mubr.f32.mxu1 %v1737_v45 }
 0x342   :  { %2697 = vmatprep.subr.bf16.mxu1 %v2696_v34 }
 0x345   :  { %2699 = vmatpush3.bf16.msra.mxu1 %v2696_v34 }
 0x346   :  { %2701 = vmatprep.subr.bf16.mxu1 %v2922_v7 }
 0x348   :  { %2551 = vmatmul.mubr.f32.vlgmr.msra.gmra.mrb[4].mxu1 %v1747_v43 }
 0x349   :  { %2703 = vmatpush3.bf16.msra.mxu1 %v2922_v7  ;;  %2561 = vmatprep.mubr.f32.mxu1 %v1737_v45 }
 0x34a   :  { %2705 = vmatprep.subr.bf16.mxu1 %v2932_v16 }
 0x34d   :  { %2707 = vmatpush3.bf16.msra.mxu1 %v2932_v16 }
 0x350   :  { %2562 = vmatmul.mubr.f32.vlgmr.msra.gmra.mrb[4].mxu1 %v1747_v43 }
 0x423   :  { %v2563_v55 = vpop.f32.mrb[4].mxu1 }
 0x424   :  { %v2718_v56 = vadd.f32 %v2563_v55, %v2209_v54  ;;  %v2186_v57 = vpop.f32.mrb[5].mxu1 }
 0x425   :  { %v2719_v58 = vadd.f32 %v2209_v54, %v2186_v57 }
 0x426   :  { %v2197_v59 = vmax.f32 %v2718_v56, 0.0 }
 0x427   :  { %v2196_v60 = vmax.f32 %v2719_v58, 0.0 }
 0x428   :  { %2200 = vst.msk [vmem:[%s2967_s9 + $0x8] sm:$0xff] %vm2198_vm3, %v2197_v59 }
 0x429   :  { %2199 = vst.msk [vmem:[%s2967_s9] sm:$0xff] %vm2198_vm3, %v2196_v60 }
 0x42a   :  { %2205 = vsyncpa [#allocation3], 1 }

</bundles_post_ra>
